<compile_context>
chip_gen: v7x
topology: tpu7x:2x2x1
jax: 0.10.0
libtpu: 0.0.40
codegen_flags: <defaults>
</compile_context>

<pallas_src>
import jax
import jax.numpy as jnp
from jax.experimental import pallas as pl
from jax.experimental.pallas import tpu as pltpu

LANE = 128
SUBLANE = 8


def _round_up(x, m):
    return ((x + m - 1) // m) * m


def _vmem_limit_bytes():
    """~3/4 of physical VMEM per generation (≈96 MiB v5e/v6e, ≈48 MiB v7x)."""
    try:
        cap = int(pltpu.get_tpu_info().vmem_capacity_bytes)
        return max(32 * 1024 * 1024, min((cap * 3) // 4, 112 * 1024 * 1024))
    except Exception:
        return 48 * 1024 * 1024  # conservative: fits every generation


def mlp_decoder_kernel(z_ref, w1_ref, b1_ref, w2_ref, b2_ref, w3_ref, b3_ref, o_ref):
    # In-kernel cast to bf16 (no separate wrapper astype pass over HBM).
    z = z_ref[...].astype(w1_ref.dtype)
    # Layer 1: Linear(in_dim, 32 -> 128 padded) + Tanh.  bf16 MXU operands,
    # f32 accumulation; tanh evaluated in bf16 (halves EUP vreg ops on
    # v6e/v7x and doubles as the cast feeding the next matmul).
    h1 = jnp.tanh(
        (jnp.dot(z, w1_ref[...], preferred_element_type=jnp.float32)
         + b1_ref[...]).astype(w2_ref.dtype))
    # Layer 2: Linear(128, 128 padded) + Tanh.
    h2 = jnp.tanh(
        (jnp.dot(h1, w2_ref[...], preferred_element_type=jnp.float32)
         + b2_ref[...]).astype(w3_ref.dtype))
    # Layer 3: Linear(128, 128 padded), no activation.  Store only the true
    # output_dim lanes (narrow masked vst -> HBM write stream is output_dim
    # wide, not 128-lane padded).
    out = (jnp.dot(h2, w3_ref[...], preferred_element_type=jnp.float32)
           + b3_ref[...])
    o_ref[...] = out[:, :o_ref.shape[-1]].astype(o_ref.dtype)


def init_params(key, input_dim, output_dim):
    """nn.Linear-style init: U[-1/sqrt(fan_in), 1/sqrt(fan_in)]; W stored (in, out)."""
    dims = [(input_dim, 32), (32, 64), (64, output_dim)]
    params = {}
    for idx, (fan_in, fan_out) in enumerate(dims, start=1):
        key, kw, kb = jax.random.split(key, 3)
        bound = 1.0 / jnp.sqrt(fan_in)
        params[f"w{idx}"] = jax.random.uniform(
            kw, (fan_in, fan_out), jnp.float32, minval=-bound, maxval=bound)
        params[f"b{idx}"] = jax.random.uniform(
            kb, (1, fan_out), jnp.float32, minval=-bound, maxval=bound)
    return params


def pad_params(params, *, weight_dtype=jnp.bfloat16):
    """Zero-pad hidden/output feature dims to multiples of 128 lanes (done once,
    fused into the stored weights).  Numerically exact (tanh(0)=0, zero
    rows/cols contribute nothing); casts weights to bf16 for MXU-native
    bf16 x bf16 -> f32 matmuls.  Returns (padded_params, out_dim)."""
    in_dim, h1 = params["w1"].shape
    h2 = params["w2"].shape[1]
    out_dim = params["w3"].shape[1]
    h1p, h2p, outp = (_round_up(d, LANE) for d in (h1, h2, out_dim))
    padded = {
        "w1": jnp.pad(params["w1"], ((0, 0), (0, h1p - h1))).astype(weight_dtype),
        "b1": jnp.pad(params["b1"], ((0, 0), (0, h1p - h1))).astype(jnp.float32),
        "w2": jnp.pad(params["w2"], ((0, h1p - h1), (0, h2p - h2))).astype(weight_dtype),
        "b2": jnp.pad(params["b2"], ((0, 0), (0, h2p - h2))).astype(jnp.float32),
        "w3": jnp.pad(params["w3"], ((0, h2p - h2), (0, outp - out_dim))).astype(weight_dtype),
        "b3": jnp.pad(params["b3"], ((0, 0), (0, outp - out_dim))).astype(jnp.float32),
    }
    return padded, out_dim


def mlp_decoder(z, padded_params, out_dim, *, batch_tile=None, out_dtype=jnp.float32):
    """z: (B, input_dim) in any float dtype (bf16 producer output is ideal;
    f32 is cast in-kernel).  padded_params from pad_params().  Returns
    (B, out_dim) in out_dtype (jnp.bfloat16 halves the HBM write stream)."""
    B, in_dim = z.shape
    w1, b1 = padded_params["w1"], padded_params["b1"]
    w2, b2 = padded_params["w2"], padded_params["b2"]
    w3, b3 = padded_params["w3"], padded_params["b3"]
    h1p, h2p, outp = w1.shape[1], w2.shape[1], w3.shape[1]

    vmem_limit = _vmem_limit_bytes()
    in_itemsize = jnp.dtype(z.dtype).itemsize
    out_itemsize = jnp.dtype(out_dtype).itemsize

    # Tile selection: derive the cap from a VMEM budget (double-buffered z/out
    # streams + ~3 KiB/row of f32/bf16 intermediates, ~60% of the scoped
    # limit), cap at 8192 rows, and aim for ~8 grid steps so per-step overhead
    # (~0.35 us) amortizes and v7x's two TensorCores each get >= 4 pipelined
    # steps.  The batch is never padded: small B just uses fewer steps.
    if batch_tile is None:
        per_row = 2 * (in_dim * in_itemsize + out_dim * out_itemsize) + 3072
        tile_cap = max(256, min(8192,
                                (int(vmem_limit * 0.6) // per_row) // SUBLANE * SUBLANE))
        batch_tile = max(SUBLANE, min(tile_cap, _round_up(pl.cdiv(B, 8), SUBLANE)))
    else:
        batch_tile = max(SUBLANE, _round_up(batch_tile, SUBLANE))
    if B < SUBLANE:
        batch_tile = B  # block == full array dim keeps the (8,128) rule satisfied
    grid = (pl.cdiv(B, batch_tile),)

    weight_bytes = sum(int(a.size) * a.dtype.itemsize for a in (w1, b1, w2, b2, w3, b3))
    cost = pl.CostEstimate(
        flops=2 * B * (in_dim * h1p + h1p * h2p + h2p * outp),
        transcendentals=B * (h1p + h2p),
        bytes_accessed=B * in_dim * in_itemsize + B * out_dim * out_itemsize + weight_bytes,
    )

    return pl.pallas_call(
        mlp_decoder_kernel,
        out_shape=jax.ShapeDtypeStruct((B, out_dim), out_dtype),
        grid=grid,
        in_specs=[
            pl.BlockSpec((batch_tile, in_dim), lambda i: (i, 0)),  # z: tiled over batch
            pl.BlockSpec(w1.shape, lambda i: (0, 0)),              # grid-invariant weights
            pl.BlockSpec(b1.shape, lambda i: (0, 0)),
            pl.BlockSpec(w2.shape, lambda i: (0, 0)),
            pl.BlockSpec(b2.shape, lambda i: (0, 0)),
            pl.BlockSpec(w3.shape, lambda i: (0, 0)),
            pl.BlockSpec(b3.shape, lambda i: (0, 0)),
        ],
        out_specs=pl.BlockSpec((batch_tile, out_dim), lambda i: (i, 0)),  # narrow store
        compiler_params=pltpu.CompilerParams(
            dimension_semantics=("parallel",),   # 2-TC sharding on v7x
            vmem_limit_bytes=vmem_limit,
        ),
        cost_estimate=cost,
    )(z, w1, b1, w2, b2, w3, b3)


def mlp_decoder_ref_f32(z, params):
    """Pure f32 reference (matches the PyTorch module semantics)."""
    h1 = jnp.tanh(z @ params["w1"] + params["b1"])
    h2 = jnp.tanh(h1 @ params["w2"] + params["b2"])
    return h2 @ params["w3"] + params["b3"]


def mlp_decoder_ref_matched(z, padded_params, out_dim):
    """Reference using the same bf16 operand / bf16-tanh rounding as the kernel."""
    p = padded_params
    x = z.astype(jnp.bfloat16)
    h1 = jnp.tanh((jnp.dot(x, p["w1"], preferred_element_type=jnp.float32)
                   + p["b1"]).astype(jnp.bfloat16))
    h2 = jnp.tanh((jnp.dot(h1, p["w2"], preferred_element_type=jnp.float32)
                   + p["b2"]).astype(jnp.bfloat16))
    out = jnp.dot(h2, p["w3"], preferred_element_type=jnp.float32) + p["b3"]
    return out[:, :out_dim]


if __name__ == "__main__":
    key = jax.random.PRNGKey(0)
    kz, kp = jax.random.split(key)

    batch, input_dim, output_dim = 8, 16, 8
    z = jax.random.normal(kz, (batch, input_dim), jnp.float32)
    params = init_params(kp, input_dim, output_dim)
    padded_params, out_dim = pad_params(params)

    out = jax.block_until_ready(mlp_decoder(z, padded_params, out_dim))
    assert out.shape == (batch, output_dim)
    assert out.dtype == jnp.float32

    # 1) Tight check vs a reference using the identical bf16-rounded operands
    #    and bf16 tanh (tolerance covers tanh-implementation ulp differences).
    ref_matched = mlp_decoder_ref_matched(z, padded_params, out_dim)
    assert jnp.allclose(out, ref_matched, atol=2e-2, rtol=2e-2)

    # 2) Semantic check vs the pure-f32 PyTorch-equivalent reference
    #    (looser tolerance accounts for bf16 input/weight/tanh rounding).
    ref_f32 = mlp_decoder_ref_f32(z, params)
    assert jnp.allclose(out, ref_f32, atol=5e-2, rtol=5e-2)

    print("KERNEL_OK")
</pallas_src>

<mosaic_0001>
module attributes {stable_mosaic.version = 11 : i64} {
  func.func @mlp_decoder_kernel(%arg0: i32, %arg1: memref<8x16xf32, #tpu.memory_space<vmem>>, %arg2: memref<16x128xbf16, #tpu.memory_space<vmem>>, %arg3: memref<1x128xf32, #tpu.memory_space<vmem>>, %arg4: memref<128x128xbf16, #tpu.memory_space<vmem>>, %arg5: memref<1x128xf32, #tpu.memory_space<vmem>>, %arg6: memref<128x128xbf16, #tpu.memory_space<vmem>>, %arg7: memref<1x128xf32, #tpu.memory_space<vmem>>, %arg8: memref<8x8xf32, #tpu.memory_space<vmem>>) attributes {dimension_semantics = [#tpu.dimension_semantics<parallel>], iteration_bounds = array<i64: 1>, scalar_prefetch = 0 : i64, scratch_operands = 0 : i64, tpu.core_type = #tpu.core_type<tc>, window_params = [{transform_indices = @transform_0, window_bounds = array<i64: 8, 16>}, {pipeline_mode = #tpu.pipeline_mode<synchronous>, transform_indices = @transform_1, window_bounds = array<i64: 16, 128>}, {pipeline_mode = #tpu.pipeline_mode<synchronous>, transform_indices = @transform_2, window_bounds = array<i64: 1, 128>}, {pipeline_mode = #tpu.pipeline_mode<synchronous>, transform_indices = @transform_3, window_bounds = array<i64: 128, 128>}, {pipeline_mode = #tpu.pipeline_mode<synchronous>, transform_indices = @transform_4, window_bounds = array<i64: 1, 128>}, {pipeline_mode = #tpu.pipeline_mode<synchronous>, transform_indices = @transform_5, window_bounds = array<i64: 128, 128>}, {pipeline_mode = #tpu.pipeline_mode<synchronous>, transform_indices = @transform_6, window_bounds = array<i64: 1, 128>}, {transform_indices = @transform_7, window_bounds = array<i64: 8, 8>}]} {
    %c0 = arith.constant 0 : index
    %c0_0 = arith.constant 0 : index
    %0 = vector.load %arg1[%c0, %c0_0] : memref<8x16xf32, #tpu.memory_space<vmem>>, vector<8x16xf32>
    %1 = arith.truncf %0 : vector<8x16xf32> to vector<8x16xbf16>
    %c0_1 = arith.constant 0 : index
    %c0_2 = arith.constant 0 : index
    %2 = vector.load %arg2[%c0_1, %c0_2] : memref<16x128xbf16, #tpu.memory_space<vmem>>, vector<16x128xbf16>
    %cst = arith.constant dense<0.000000e+00> : vector<8x128xf32>
    %3 = tpu.matmul %1, %2, %cst {dimension_numbers = #tpu.dot_dimension_numbers<[1], [0], [0], [1], [0, 0, 1, 1], [], []>} : vector<8x16xbf16>, vector<16x128xbf16>, vector<8x128xf32> -> vector<8x128xf32>
    %c0_3 = arith.constant 0 : index
    %c0_4 = arith.constant 0 : index
    %4 = vector.load %arg3[%c0_3, %c0_4] : memref<1x128xf32, #tpu.memory_space<vmem>>, vector<1x128xf32>
    %5 = vector.broadcast %4 : vector<1x128xf32> to vector<8x128xf32>
    %6 = arith.addf %3, %5 : vector<8x128xf32>
    %7 = arith.truncf %6 : vector<8x128xf32> to vector<8x128xbf16>
    %8 = math.tanh %7 : vector<8x128xbf16>
    %c0_5 = arith.constant 0 : index
    %c0_6 = arith.constant 0 : index
    %9 = vector.load %arg4[%c0_5, %c0_6] : memref<128x128xbf16, #tpu.memory_space<vmem>>, vector<128x128xbf16>
    %cst_7 = arith.constant dense<0.000000e+00> : vector<8x128xf32>
    %10 = tpu.matmul %8, %9, %cst_7 {dimension_numbers = #tpu.dot_dimension_numbers<[1], [0], [0], [1], [0, 0, 1, 1], [], []>} : vector<8x128xbf16>, vector<128x128xbf16>, vector<8x128xf32> -> vector<8x128xf32>
    %c0_8 = arith.constant 0 : index
    %c0_9 = arith.constant 0 : index
    %11 = vector.load %arg5[%c0_8, %c0_9] : memref<1x128xf32, #tpu.memory_space<vmem>>, vector<1x128xf32>
    %12 = vector.broadcast %11 : vector<1x128xf32> to vector<8x128xf32>
    %13 = arith.addf %10, %12 : vector<8x128xf32>
    %14 = arith.truncf %13 : vector<8x128xf32> to vector<8x128xbf16>
    %15 = math.tanh %14 : vector<8x128xbf16>
    %c0_10 = arith.constant 0 : index
    %c0_11 = arith.constant 0 : index
    %16 = vector.load %arg6[%c0_10, %c0_11] : memref<128x128xbf16, #tpu.memory_space<vmem>>, vector<128x128xbf16>
    %cst_12 = arith.constant dense<0.000000e+00> : vector<8x128xf32>
    %17 = tpu.matmul %15, %16, %cst_12 {dimension_numbers = #tpu.dot_dimension_numbers<[1], [0], [0], [1], [0, 0, 1, 1], [], []>} : vector<8x128xbf16>, vector<128x128xbf16>, vector<8x128xf32> -> vector<8x128xf32>
    %c0_13 = arith.constant 0 : index
    %c0_14 = arith.constant 0 : index
    %18 = vector.load %arg7[%c0_13, %c0_14] : memref<1x128xf32, #tpu.memory_space<vmem>>, vector<1x128xf32>
    %19 = vector.broadcast %18 : vector<1x128xf32> to vector<8x128xf32>
    %20 = arith.addf %17, %19 : vector<8x128xf32>
    %21 = vector.extract_strided_slice %20 {offsets = [0, 0], sizes = [8, 8], strides = [1, 1]} : vector<8x128xf32> to vector<8x8xf32>
    %c0_15 = arith.constant 0 : index
    %c0_16 = arith.constant 0 : index
    %22 = vector.load %arg8[%c0_15, %c0_16] : memref<8x8xf32, #tpu.memory_space<vmem>>, vector<8x8xf32>
    tpu.vector_store %arg8[%c0_15, %c0_16], %21 {strides = array<i32>} : memref<8x8xf32, #tpu.memory_space<vmem>>, vector<8x8xf32>,
    return
  }
  func.func @transform_0(%arg0: i32) -> (i32, i32) {
    %c0_i32 = arith.constant 0 : i32
    %c0_i32_0 = arith.constant 0 : i32
    return %arg0, %c0_i32 : i32, i32
  }
  func.func @transform_1(%arg0: i32) -> (i32, i32) {
    %c0_i32 = arith.constant 0 : i32
    %c0_i32_0 = arith.constant 0 : i32
    %c0_i32_1 = arith.constant 0 : i32
    return %c0_i32, %c0_i32_0 : i32, i32
  }
  func.func @transform_2(%arg0: i32) -> (i32, i32) {
    %c0_i32 = arith.constant 0 : i32
    %c0_i32_0 = arith.constant 0 : i32
    %c0_i32_1 = arith.constant 0 : i32
    return %c0_i32, %c0_i32_0 : i32, i32
  }
  func.func @transform_3(%arg0: i32) -> (i32, i32) {
    %c0_i32 = arith.constant 0 : i32
    %c0_i32_0 = arith.constant 0 : i32
    %c0_i32_1 = arith.constant 0 : i32
    return %c0_i32, %c0_i32_0 : i32, i32
  }
  func.func @transform_4(%arg0: i32) -> (i32, i32) {
    %c0_i32 = arith.constant 0 : i32
    %c0_i32_0 = arith.constant 0 : i32
    %c0_i32_1 = arith.constant 0 : i32
    return %c0_i32, %c0_i32_0 : i32, i32
  }
  func.func @transform_5(%arg0: i32) -> (i32, i32) {
    %c0_i32 = arith.constant 0 : i32
    %c0_i32_0 = arith.constant 0 : i32
    %c0_i32_1 = arith.constant 0 : i32
    return %c0_i32, %c0_i32_0 : i32, i32
  }
  func.func @transform_6(%arg0: i32) -> (i32, i32) {
    %c0_i32 = arith.constant 0 : i32
    %c0_i32_0 = arith.constant 0 : i32
    %c0_i32_1 = arith.constant 0 : i32
    return %c0_i32, %c0_i32_0 : i32, i32
  }
  func.func @transform_7(%arg0: i32) -> (i32, i32) {
    %c0_i32 = arith.constant 0 : i32
    %c0_i32_0 = arith.constant 0 : i32
    return %arg0, %c0_i32 : i32, i32
  }
}

</mosaic_0001>

<bundles_post_ra>
// kernel: tpu_custom_call.1
= control target key start
LH: loop header
LB: loop body
LE: loop exit
PB: predicated region body
PF: predicated region fallthrough
CT: control target
= control target key end

     0   :  { %12 = vsyncpa [#allocation3], 0  ;;  %s772_s0 = inlined_call_operand.hbm [shape: f32[8,16], index: 0, kind: input, shape index: {}]   ;;  %s773_s1 = inlined_call_operand.hbm [shape: bf16[16,128], index: 1, kind: input, shape index: {}]   ;;  %s774_s2 = inlined_call_operand.vmem [shape: f32[1,128], index: 2, kind: input, shape index: {}]   ;;  %s775_s3 = inlined_call_operand.hbm [shape: bf16[128,128], index: 3, kind: input, shape index: {}]   ;;  %s776_s4 = inlined_call_operand.vmem [shape: f32[1,128], index: 4, kind: input, shape index: {}]   ;;  %s777_s5 = inlined_call_operand.hbm [shape: bf16[128,128], index: 5, kind: input, shape index: {}]   ;;  %s778_s6 = inlined_call_operand.vmem [shape: f32[1,128], index: 6, kind: input, shape index: {}]   ;;  %s779_s7 = inlined_call_operand.hbm [shape: f32[8,8], index: 7, kind: output, shape index: {}]  }
   0x1   :  { %13 = vsyncpa [#allocation6], 0 }
   0x2   :  { %14 = vsyncpa [#allocation9], 0 }
   0x3   :  { %15 = vsyncpa [#allocation4], 0  ;;  %s622_s24 = smov [#allocation5]   ;;  %s504_s28 = scalar_lea.hbm %s773_s1, 128 }
   0x4   :  { %s31_s25 = sshll.u32 %s622_s24, 4  ;;  %p505_p0 = scmp.ne.s32.totalorder %s773_s1, %s504_s28  ;;  %s32_s25 = int_to_ptr.vmem [resolvable:$true] %s31_s25 }
   0x5   :  { %p508_p1 = scmp.lt.u32.totalorder %s504_s28, %s773_s1 }
   0x7   :  { %p510_p2 = pnand %p508_p1, %p505_p0 }
   0x9   :  { %513 = shalt.err (!%p510_p2)
}
   0xa   :  { %s514_s10 = scalar_lea.vmem %s32_s25, 128  ;;  %p519_p4 = scmp.lt.s32.totalorder %s32_s25, %s32_s25 }
   0xb   :  { %p515_p3 = scmp.ne.s32.totalorder %s32_s25, %s514_s10  ;;  %p520_p5 = scmp.lt.s32.totalorder %s514_s10, %s514_s10 }
   0xd   :  { %p521_p6 = por %p520_p5, %p519_p4 }
   0xf   :  { %p522_p7 = pnand %p521_p6, %p515_p3 }
  0x11   :  { %525 = shalt.err (!%p522_p7)
}
  0x12   :  { %s623_s11 = smov 64   ;;  %s624_s12 = smov 4  }
  0x13   :  { %37 = dma.hbm_to_vmem [thread:$0]  %s773_s1, 128, %s32_s25, [#allocation6], %s623_s11, %s623_s11, %s624_s12  }
  0x14   :  { %s625_s15 = smov [#allocation2]   ;;  %s626_s17 = smov [#allocation7]  }
  0x15   :  { %s22_s16 = sshll.u32 %s625_s15, 4  ;;  %s45_s18 = sshll.u32 %s626_s17, 4  ;;  %s23_s16 = int_to_ptr.vmem [resolvable:$true] %s22_s16  ;;  %s46_s18 = int_to_ptr.vmem [resolvable:$true] %s45_s18 }
  0x16   :  { %s526_s21 = scalar_lea.hbm %s772_s0, 128 }
  0x17   :  { %p527_p8 = scmp.ne.s32.totalorder %s772_s0, %s526_s21  ;;  %p530_p9 = scmp.lt.u32.totalorder %s526_s21, %s772_s0 }
  0x19   :  { %p532_p10 = pnand %p530_p9, %p527_p8 }
  0x1b   :  { %535 = shalt.err (!%p532_p10)
}
  0x1c   :  { %s536_s1 = scalar_lea.vmem %s23_s16, 128  ;;  %p541_p12 = scmp.lt.s32.totalorder %s23_s16, %s23_s16 }
  0x1d   :  { %p537_p11 = scmp.ne.s32.totalorder %s23_s16, %s536_s1  ;;  %p542_p13 = scmp.lt.s32.totalorder %s536_s1, %s536_s1 }
  0x1f   :  { %p543_p0 = por %p542_p13, %p541_p12 }
  0x21   :  { %p544_p1 = pnand %p543_p0, %p537_p11 }
  0x23   :  { %547 = shalt.err (!%p544_p1)
}
  0x24   :  { %25 = dma.hbm_to_vmem [thread:$0]  %s772_s0, 128, %s23_s16, [#allocation3]  }
  0x25   :  { %s548_s30 = scalar_lea.hbm %s775_s3, 1024 }
  0x26   :  { %p549_p2 = scmp.ne.s32.totalorder %s775_s3, %s548_s30  ;;  %p552_p3 = scmp.lt.u32.totalorder %s548_s30, %s775_s3 }
  0x28   :  { %p554_p4 = pnand %p552_p3, %p549_p2 }
  0x2a   :  { %557 = shalt.err (!%p554_p4)
}
  0x2b   :  { %s558_s14 = scalar_lea.vmem %s46_s18, 1024  ;;  %p563_p6 = scmp.lt.s32.totalorder %s46_s18, %s46_s18 }
  0x2c   :  { %p559_p5 = scmp.ne.s32.totalorder %s46_s18, %s558_s14  ;;  %p564_p7 = scmp.lt.s32.totalorder %s558_s14, %s558_s14 }
  0x2e   :  { %p565_p8 = por %p564_p7, %p563_p6 }
  0x30   :  { %p566_p9 = pnand %p565_p8, %p559_p5 }
  0x32   :  { %569 = shalt.err (!%p566_p9)
}
  0x33   :  { %51 = dma.hbm_to_vmem [thread:$0]  %s775_s3, 1024, %s46_s18, [#allocation6], %s623_s11, %s623_s11, %s624_s12  }
  0x34   :  { %s627_s16 = smov [#allocation8]   ;;  %s570_s21 = scalar_lea.hbm %s777_s5, 1024 }
  0x35   :  { %s59_s17 = sshll.u32 %s627_s16, 4  ;;  %p571_p10 = scmp.ne.s32.totalorder %s777_s5, %s570_s21  ;;  %s60_s17 = int_to_ptr.vmem [resolvable:$true] %s59_s17 }
  0x36   :  { %p574_p11 = scmp.lt.u32.totalorder %s570_s21, %s777_s5 }
  0x38   :  { %p576_p12 = pnand %p574_p11, %p571_p10 }
  0x3a   :  { %579 = shalt.err (!%p576_p12)
}
  0x3b   :  { %s580_s1 = scalar_lea.vmem %s60_s17, 1024  ;;  %p585_p0 = scmp.lt.s32.totalorder %s60_s17, %s60_s17 }
  0x3c   :  { %p581_p13 = scmp.ne.s32.totalorder %s60_s17, %s580_s1  ;;  %p586_p1 = scmp.lt.s32.totalorder %s580_s1, %s580_s1 }
  0x3e   :  { %p587_p2 = por %p586_p1, %p585_p0 }
  0x40   :  { %p588_p3 = pnand %p587_p2, %p581_p13 }
  0x42   :  { %591 = shalt.err (!%p588_p3)
}
  0x43   :  { %65 = dma.hbm_to_vmem [thread:$0]  %s777_s5, 1024, %s60_s17, [#allocation9], %s623_s11, %s623_s11, %s624_s12  }
  0x44   :  { %614 = dma.done.wait [#allocation3], 128  }
  0x45   :  { %615 = vsyncadd [#allocation3], 4294967168 }
  0x46   :  { %616 = dma.done.wait [#allocation6], 1152  }
  0x47   :  { %617 = vsyncadd [#allocation6], 4294966144 }
  0x48   :  { %618 = dma.done.wait [#allocation9], 1024  }
  0x49   :  { %619 = vsyncadd [#allocation9], 4294966272  ;;  %v628_v0 = vmov 0.0   ;;  %vm629_vm0 = vmmov 0   ;;  %v483_v1 = vld [vmem:[#allocation5] sm:$0xff]   ;;  %v81_v2 = vld [vmem:[#allocation2] sm:$0xff] }
  0x4a   :  { %428 = vmatprep.subr.bf16.mxu0 %v628_v0  ;;  %430 = vmatprep.mubr.msk.bf16.mxu0 %vm629_vm0, %v628_v0  ;;  %v82_v3 = vpack.c.bf16 %v81_v2, %v81_v2  ;;  %vm98_vm1 = vcmask 130048   ;;  %v484_v4 = vld [vmem:[#allocation7] sm:$0xff]   ;;  %v485_v5 = vld [vmem:[#allocation7 + $0x8] sm:$0xff]   ;;  %v486_v6 = vld [vmem:[#allocation7 + $0x10] sm:$0xff]   ;;  %s630_s28 = smov [#allocation10]   ;;  %vm368_vm2 = vcmask 64512  }
  0x4b   :  { %434 = vmatprep.subr.bf16.mxu1 %v628_v0  ;;  %450 = vmatprep.mubr.msk.bf16.mxu1 %vm629_vm0, %v628_v0  ;;  %v487_v7 = vld [vmem:[#allocation7 + $0x18] sm:$0xff]   ;;  %v488_v8 = vld [vmem:[#allocation7 + $0x20] sm:$0xff]   ;;  %v489_v9 = vld [vmem:[#allocation7 + $0x28] sm:$0xff]   ;;  %s376_s29 = sshll.u32 %s630_s28, 4  ;;  %s377_s29 = int_to_ptr.vmem [resolvable:$true] %s376_s29 }
  0x4c   :  { %429 = vmatpush3.bf16.msra.mxu0 %v483_v1  ;;  %435 = vmatpush3.bf16.msra.mxu1 %v484_v4  ;;  %v490_v10 = vld [vmem:[#allocation7 + $0x30] sm:$0xff]   ;;  %v491_v11 = vld [vmem:[#allocation7 + $0x38] sm:$0xff]   ;;  %v492_v12 = vld [vmem:[#allocation8] sm:$0xff]   ;;  %p597_p5 = scmp.lt.s32.totalorder %s377_s29, %s377_s29 }
  0x4d   :  { %454 = vmatprep.subr.bf16.mxu0 %v628_v0  ;;  %436 = vmatprep.subr.bf16.mxu1 %v628_v0  ;;  %v493_v13 = vld [vmem:[#allocation8 + $0x8] sm:$0xff]   ;;  %v494_v14 = vld [vmem:[#allocation8 + $0x10] sm:$0xff]   ;;  %v495_v15 = vld [vmem:[#allocation8 + $0x18] sm:$0xff]  }
  0x4e   :  { %v387_v16 = vld [vmem:[%s774_s2] ss:$0 sm:$0xff]  ;;  %v496_v24 = vld [vmem:[#allocation8 + $0x20] sm:$0xff]   ;;  %v497_v25 = vld [vmem:[#allocation8 + $0x28] sm:$0xff]  }
  0x4f   :  { %431 = vmatmul.mubr.msk.bf16.vlgmr.msra.gmra.mrb[0].mxu0 %vm98_vm1, %v82_v3  ;;  %v498_v26 = vld [vmem:[#allocation8 + $0x30] sm:$0xff]   ;;  %v499_v27 = vld [vmem:[#allocation8 + $0x38] sm:$0xff]  }
  0x50   :  { %470 = vmatprep.mubr.msk.bf16.mxu0 %vm629_vm0, %v628_v0  ;;  %437 = vmatpush3.bf16.msra.mxu1 %v485_v5  ;;  %v390_v28 = vld [vmem:[%s776_s4] ss:$0 sm:$0xff]  ;;  %s592_s4 = scalar_lea.vmem %s377_s29, 128 }
  0x51   :  { %438 = vmatprep.subr.bf16.mxu1 %v628_v0  ;;  %455 = vmatpush3.bf16.msra.mxu0 %v492_v12  ;;  %v399_v36 = vld [vmem:[%s778_s6] ss:$0 sm:$0xff]  ;;  %p593_p4 = scmp.ne.s32.totalorder %s377_s29, %s592_s4  ;;  %p598_p6 = scmp.lt.s32.totalorder %s592_s4, %s592_s4 }
  0x52   :  { %456 = vmatprep.subr.bf16.mxu0 %v628_v0 }
  0x53   :  { %p599_p7 = por %p598_p6, %p597_p5 }
  0x54   :  { %439 = vmatpush3.bf16.msra.mxu1 %v486_v6 }
  0x55   :  { %440 = vmatprep.subr.bf16.mxu1 %v628_v0  ;;  %457 = vmatpush3.bf16.msra.mxu0 %v493_v13  ;;  %p600_p8 = pnand %p599_p7, %p593_p4 }
  0x56   :  { %458 = vmatprep.subr.bf16.mxu0 %v628_v0 }
  0x58   :  { %441 = vmatpush3.bf16.msra.mxu1 %v487_v7 }
  0x59   :  { %442 = vmatprep.subr.bf16.mxu1 %v628_v0  ;;  %459 = vmatpush3.bf16.msra.mxu0 %v494_v14 }
  0x5a   :  { %460 = vmatprep.subr.bf16.mxu0 %v628_v0 }
  0x5c   :  { %443 = vmatpush3.bf16.msra.mxu1 %v488_v8 }
  0x5d   :  { %444 = vmatprep.subr.bf16.mxu1 %v628_v0  ;;  %461 = vmatpush3.bf16.msra.mxu0 %v495_v15 }
  0x5e   :  { %462 = vmatprep.subr.bf16.mxu0 %v628_v0 }
  0x60   :  { %445 = vmatpush3.bf16.msra.mxu1 %v489_v9 }
  0x61   :  { %446 = vmatprep.subr.bf16.mxu1 %v628_v0  ;;  %463 = vmatpush3.bf16.msra.mxu0 %v496_v24 }
  0x62   :  { %464 = vmatprep.subr.bf16.mxu0 %v628_v0 }
  0x64   :  { %447 = vmatpush3.bf16.msra.mxu1 %v490_v10 }
  0x65   :  { %448 = vmatprep.subr.bf16.mxu1 %v628_v0  ;;  %465 = vmatpush3.bf16.msra.mxu0 %v497_v25 }
  0x66   :  { %466 = vmatprep.subr.bf16.mxu0 %v628_v0 }
  0x68   :  { %449 = vmatpush3.bf16.msra.mxu1 %v491_v11 }
  0x69   :  { %467 = vmatpush3.bf16.msra.mxu0 %v498_v26 }
  0x6a   :  { %468 = vmatprep.subr.bf16.mxu0 %v628_v0 }
  0x6d   :  { %469 = vmatpush3.bf16.msra.mxu0 %v499_v27 }
 0x122   :  { %v136_v17 = vpop.f32.mrb[0].mxu0 }
 0x123   :  { %v137_v18 = vadd.f32 %v387_v16, %v136_v17  ;;  %v432_v19 = vpop.f32.mrb[1].mxu0 }
 0x124   :  { %v139_v20 = vpop.f32.mrb[2].mxu0 }
 0x125   :  { %v142_v21 = vpack.c.bf16 %v137_v18, %v137_v18  ;;  %v433_v22 = vpop.f32.mrb[3].mxu0 }
 0x127   :  { %500 = vtanh.bf16 %v142_v21 }
 0x132   :  { %v501_v23 = vpop.eup %500 }
 0x133   :  { %451 = vmatmul.mubr.bf16.vlgmr.msra.gmra.mrb[0].mxu1 %v501_v23 }
 0x206   :  { %v249_v29 = vpop.f32.mrb[0].mxu1 }
 0x207   :  { %v250_v30 = vadd.f32 %v390_v28, %v249_v29  ;;  %v452_v31 = vpop.f32.mrb[1].mxu1 }
 0x208   :  { %v252_v32 = vpop.f32.mrb[2].mxu1 }
 0x209   :  { %v255_v33 = vpack.c.bf16 %v250_v30, %v250_v30  ;;  %v453_v34 = vpop.f32.mrb[3].mxu1 }
 0x20b   :  { %502 = vtanh.bf16 %v255_v33 }
 0x216   :  { %v503_v35 = vpop.eup %502 }
 0x217   :  { %471 = vmatmul.mubr.bf16.vlgmr.msra.gmra.mrb[4].mxu0 %v503_v35 }
 0x2ea   :  { %v362_v37 = vpop.f32.mrb[4].mxu0 }
 0x2eb   :  { %v363_v38 = vadd.f32 %v399_v36, %v362_v37  ;;  %v472_v39 = vpop.f32.mrb[5].mxu0 }
 0x2ec   :  { %v365_v40 = vpop.f32.mrb[6].mxu0 }
 0x2ed   :  { %v473_v41 = vpop.f32.mrb[7].mxu0  ;;  %369 = vst.msk [vmem:[#allocation10] sm:$0xff] %vm368_vm2, %v363_v38 }
 0x2ee   :  { %603 = shalt.err (!%p600_p8)
}
 0x2ef   :  { %s604_s6 = scalar_lea.hbm %s779_s7, 128 }
 0x2f0   :  { %p605_p9 = scmp.ne.s32.totalorder %s779_s7, %s604_s6  ;;  %p608_p10 = scmp.lt.u32.totalorder %s604_s6, %s779_s7 }
 0x2f2   :  { %p610_p11 = pnand %p608_p10, %p605_p9 }
 0x2f4   :  { %613 = shalt.err (!%p610_p11)
}
 0x2f5   :  { %379 = dma.vmem_to_hbm [thread:$0]  %s377_s29, 128, %s779_s7, [#allocation4]  }
 0x2f6   :  { %620 = dma.done.wait [#allocation4], 128  }
 0x2f7   :  { %621 = vsyncadd [#allocation4], 4294967168 }
 0x2f8   :  { %383 = vsyncpa [#allocation3], 1 }
 0x2f9   :  { %384 = vsyncpa [#allocation6], 1 }
 0x2fa   :  { %385 = vsyncpa [#allocation9], 1 }
 0x2fb   :  { %386 = vsyncpa [#allocation4], 1 }

</bundles_post_ra>
